<compile_context>
chip_gen: v6e
topology: v6e:2x2x1
jax: 0.10.0
libtpu: 0.0.40
codegen_flags: <defaults>
</compile_context>

<pallas_src>
import math

import jax
import jax.numpy as jnp
from jax.experimental import pallas as pl
from jax.experimental.pallas import tpu as pltpu


def _pick_tile(n, max_tile, granularity=8):
    """Largest tile <= max_tile dividing n, preferring `granularity` multiples.

    Falls back to the full dimension (always layout-legal) only when n has no
    multiple-of-8 divisor <= max_tile (pathological n)."""
    if n <= max_tile:
        return n
    for g in sorted({granularity, 8}, reverse=True):
        start = max_tile - (max_tile % g)
        for t in range(start, 0, -g):
            if n % t == 0:
                return t
    return n


def _dtype_bytes(dt):
    return jnp.dtype(dt).itemsize


def _vmem_budget(block_entries, scratch_bytes=0):
    """Explicit VMEM budget from block sizes.

    block_entries: iterable of (elements, bytes_per_element); each BlockSpec is
    double-buffered by the pipeline.  50% + 2 MiB headroom for compiler
    scratch/spills; clamped to stay meaningful on every generation."""
    total = sum(2 * int(n) * int(b) for n, b in block_entries) + int(scratch_bytes)
    budget = int(total * 1.5) + (2 << 20)
    return max(16 << 20, min(budget, 100 << 20))


# ---------------------------------------------------------------------------
# Kernel 1: per (batch, seq-tile) QKV projection, emitted head-major.
#   x_ref : (1, tm, K)
#   w_ref : (3, h, K, d)   [Wq | Wk | Wv] per head, 1/sqrt(d) folded into Wq
#   b_ref : (3, h, 1, d)   biases (f32), 1/sqrt(d) folded into bq
#   q/k/v : (1, h, tm, d)  head-major outputs -> no XLA transpose pass later
# Each per-head matmul contracts over the full K=H depth (MXU-friendly).
# ---------------------------------------------------------------------------
def _qkv_head_kernel(x_ref, w_ref, b_ref, q_ref, k_ref, v_ref):
    x = x_ref[0]                                  # (tm, K)
    outs = (q_ref, k_ref, v_ref)
    n_heads = w_ref.shape[1]
    for t in range(3):
        o_ref = outs[t]
        for h in range(n_heads):
            y = jnp.dot(x, w_ref[t, h], preferred_element_type=jnp.float32)
            o_ref[0, h] = (y + b_ref[t, h]).astype(o_ref.dtype)


# ---------------------------------------------------------------------------
# Kernel 2: flash-style attention over a streamed K/V axis + fused out-proj.
#   q_ref : (1, h, tq, d)   (scale already folded into the Q projection)
#   k_ref : (1, h, tk, d)   v_ref : (1, h, tk, d)
#   wo_ref: (h, d, H)       bo_ref: (1, H) f32        o_ref: (1, tq, H)
#   scratch: m/l (h, tq, 1) f32, acc (h, tq, d) f32 carried across kv axis.
# ---------------------------------------------------------------------------
def _flash_attn_kernel(q_ref, k_ref, v_ref, wo_ref, bo_ref, o_ref,
                       m_sc, l_sc, acc_sc):
    kv = pl.program_id(2)

    @pl.when(kv == 0)
    def _():
        m_sc[...] = jnp.full(m_sc.shape, -jnp.inf, m_sc.dtype)
        l_sc[...] = jnp.zeros(l_sc.shape, l_sc.dtype)
        acc_sc[...] = jnp.zeros(acc_sc.shape, acc_sc.dtype)

    q = q_ref[0]                                  # (h, tq, d)
    k = k_ref[0]                                  # (h, tk, d)
    v = v_ref[0]                                  # (h, tk, d)

    # Scores: head-batched matmul, f32 accumulation on the MXU.
    s = jnp.einsum('hqd,hkd->hqk', q, k, preferred_element_type=jnp.float32)

    # Online softmax with un-normalized P; normalization deferred past P.V.
    m_prev = m_sc[...]                                        # (h, tq, 1)
    m_new = jnp.maximum(m_prev, jnp.max(s, axis=-1, keepdims=True))
    alpha = jnp.exp(m_prev - m_new)                           # (h, tq, 1)
    p = jnp.exp(s - m_new)                                    # (h, tq, tk) f32
    l_sc[...] = alpha * l_sc[...] + jnp.sum(p, axis=-1, keepdims=True)
    acc_sc[...] = alpha * acc_sc[...] + jnp.einsum(
        'hqk,hkd->hqd', p.astype(v.dtype), v,
        preferred_element_type=jnp.float32)
    m_sc[...] = m_new

    @pl.when(kv == pl.num_programs(2) - 1)
    def _():
        # Deferred normalization: h*tq*d multiplies; reciprocal on the EUP.
        ctx = acc_sc[...] * pl.reciprocal(l_sc[...], approx=True)
        ctx = ctx.astype(wo_ref.dtype)                        # (h, tq, d)
        # Output projection + head-sum accumulated straight into one (tq, H)
        # f32 slab: no (h, tq, H) intermediate is ever materialized.
        out = jnp.zeros((ctx.shape[1], wo_ref.shape[-1]), jnp.float32)
        for h in range(wo_ref.shape[0]):
            out = out + jnp.dot(ctx[h], wo_ref[h],
                                preferred_element_type=jnp.float32)
        o_ref[0] = (out + bo_ref[0]).astype(o_ref.dtype)


def multi_head_attention(x, wqkv, bqkv, wout, bout, *, num_heads,
                         seq_tile=256, q_tile=256, kv_tile=512,
                         matmul_dtype=None, vmem_limit_bytes=None):
    """Forward pass of MultiHeadAttention.  x: (B, N, H); weights (in, out)."""
    B, N, H = x.shape
    assert H % num_heads == 0
    d = H // num_heads
    scale = d ** (-0.5)
    out_dtype = x.dtype
    cd = matmul_dtype if matmul_dtype is not None else x.dtype
    csize = _dtype_bytes(cd)
    osize = _dtype_bytes(out_dtype)
    gran = 16 if csize < 4 else 8

    # --- one-time, weight-only layout plumbing (no activation HBM passes) ---
    # wqkv (K, 3H) -> (3, h, K, d); fold 1/sqrt(d) into the Q projection in f32.
    sc = jnp.asarray([scale, 1.0, 1.0], jnp.float32).reshape(3, 1, 1, 1)
    w3 = wqkv.astype(jnp.float32).reshape(H, 3, num_heads, d).transpose(1, 2, 0, 3)
    w3 = (w3 * sc).astype(cd)
    b3 = bqkv.astype(jnp.float32).reshape(3, num_heads, 1, d) * sc
    wout_r = wout.reshape(num_heads, d, H).astype(cd)
    bout2 = bout.astype(jnp.float32).reshape(1, H)
    xm = x.astype(cd)

    # ------------------------- kernel 1: QKV projection ---------------------
    tm = _pick_tile(N, seq_tile, gran)
    qkv_shape = jax.ShapeDtypeStruct((B, num_heads, N, d), cd)
    vmem1 = vmem_limit_bytes or _vmem_budget([
        (tm * H, csize),                     # x tile
        (3 * num_heads * H * d, csize),      # weights
        (3 * num_heads * d, 4),              # biases
        (num_heads * tm * d, csize),         # q out
        (num_heads * tm * d, csize),         # k out
        (num_heads * tm * d, csize),         # v out
    ])
    cost1 = pl.CostEstimate(
        flops=2 * B * N * H * 3 * H,
        transcendentals=0,
        bytes_accessed=int(B * N * H * csize + 3 * H * H * csize
                           + 3 * H * 4 + 3 * B * N * H * csize))

    q, k, v = pl.pallas_call(
        _qkv_head_kernel,
        out_shape=(qkv_shape, qkv_shape, qkv_shape),
        grid_spec=pltpu.PrefetchScalarGridSpec(
            num_scalar_prefetch=0,
            grid=(B, N // tm),
            in_specs=[
                pl.BlockSpec((1, tm, H), lambda b, i: (b, i, 0)),
                pl.BlockSpec((3, num_heads, H, d), lambda b, i: (0, 0, 0, 0)),
                pl.BlockSpec((3, num_heads, 1, d), lambda b, i: (0, 0, 0, 0)),
            ],
            out_specs=(
                pl.BlockSpec((1, num_heads, tm, d), lambda b, i: (b, 0, i, 0)),
                pl.BlockSpec((1, num_heads, tm, d), lambda b, i: (b, 0, i, 0)),
                pl.BlockSpec((1, num_heads, tm, d), lambda b, i: (b, 0, i, 0)),
            ),
        ),
        compiler_params=pltpu.CompilerParams(
            dimension_semantics=("parallel", "parallel"),
            vmem_limit_bytes=vmem1),
        cost_estimate=cost1,
    )(xm, w3, b3)

    # ------------------ kernel 2: flash attention + out-proj ----------------
    tq = _pick_tile(N, q_tile, gran)
    tk = _pick_tile(N, kv_tile, gran)
    scratch_bytes = (2 * num_heads * tq                 # m, l
                     + num_heads * tq * d               # acc
                     + num_heads * tq * tk) * 4         # score slab headroom
    vmem2 = vmem_limit_bytes or _vmem_budget([
        (num_heads * tq * d, csize),         # q tile
        (num_heads * tk * d, csize),         # k tile
        (num_heads * tk * d, csize),         # v tile
        (H * H, csize),                      # wout
        (H, 4),                              # bout
        (tq * H, osize),                     # out tile
    ], scratch_bytes)
    cost2 = pl.CostEstimate(
        flops=4 * B * num_heads * N * N * d + 2 * B * N * H * H,
        transcendentals=B * num_heads * N * N,
        bytes_accessed=int(B * N * H * csize * (1 + 2 * (N // tq))
                           + H * H * csize + B * N * H * osize))

    return pl.pallas_call(
        _flash_attn_kernel,
        out_shape=jax.ShapeDtypeStruct((B, N, H), out_dtype),
        grid_spec=pltpu.PrefetchScalarGridSpec(
            num_scalar_prefetch=0,
            grid=(B, N // tq, N // tk),
            in_specs=[
                pl.BlockSpec((1, num_heads, tq, d), lambda b, i, j: (b, 0, i, 0)),
                pl.BlockSpec((1, num_heads, tk, d), lambda b, i, j: (b, 0, j, 0)),
                pl.BlockSpec((1, num_heads, tk, d), lambda b, i, j: (b, 0, j, 0)),
                pl.BlockSpec((num_heads, d, H), lambda b, i, j: (0, 0, 0)),
                pl.BlockSpec((1, H), lambda b, i, j: (0, 0)),
            ],
            out_specs=pl.BlockSpec((1, tq, H), lambda b, i, j: (b, i, 0)),
            scratch_shapes=[
                pltpu.VMEM((num_heads, tq, 1), jnp.float32),   # running max
                pltpu.VMEM((num_heads, tq, 1), jnp.float32),   # running sum
                pltpu.VMEM((num_heads, tq, d), jnp.float32),   # un-normed ctx
            ],
        ),
        compiler_params=pltpu.CompilerParams(
            dimension_semantics=("parallel", "parallel", "arbitrary"),
            vmem_limit_bytes=vmem2),
        cost_estimate=cost2,
    )(q, k, v, wout_r, bout2)


def reference_mha(x, wqkv, bqkv, wout, bout, *, num_heads):
    B, N, H = x.shape
    d = H // num_heads
    qkv = jnp.einsum("bnh,hk->bnk", x, wqkv) + bqkv
    q, k, v = jnp.split(qkv, 3, axis=-1)

    def to_heads(t):
        return t.reshape(B, N, num_heads, d).transpose(0, 2, 1, 3)  # b h n d

    q, k, v = to_heads(q), to_heads(k), to_heads(v)
    dots = jnp.einsum("bhqd,bhkd->bhqk", q, k) * (d ** -0.5)
    attn = jax.nn.softmax(dots, axis=-1)
    out = jnp.einsum("bhqk,bhkd->bhqd", attn, v)
    out = out.transpose(0, 2, 1, 3).reshape(B, N, H)
    return jnp.einsum("bnh,hk->bnk", out, wout) + bout


if __name__ == "__main__":
    B, N, hidden, num_heads = 2, 8, 32, 4

    key = jax.random.PRNGKey(0)
    kx, k1, k2, k3, k4 = jax.random.split(key, 5)

    lim = 1.0 / math.sqrt(hidden)
    x = jax.random.normal(kx, (B, N, hidden), dtype=jnp.float32)
    wqkv = jax.random.uniform(k1, (hidden, 3 * hidden), jnp.float32, -lim, lim)
    bqkv = jax.random.uniform(k2, (3 * hidden,), jnp.float32, -lim, lim)
    wout = jax.random.uniform(k3, (hidden, hidden), jnp.float32, -lim, lim)
    bout = jax.random.uniform(k4, (hidden,), jnp.float32, -lim, lim)

    ref = reference_mha(x, wqkv, bqkv, wout, bout, num_heads=num_heads)

    # f32 path (tolerance accounts for the EUP approximate reciprocal).
    out = multi_head_attention(x, wqkv, bqkv, wout, bout, num_heads=num_heads)
    out = jax.block_until_ready(out)
    assert out.shape == (B, N, hidden)
    assert jnp.allclose(out, ref, atol=5e-3, rtol=5e-3), "f32 mismatch vs reference"

    # bf16 MXU-input path (f32 accumulation + f32 softmax), looser tolerance.
    out_bf16 = multi_head_attention(x, wqkv, bqkv, wout, bout,
                                    num_heads=num_heads,
                                    matmul_dtype=jnp.bfloat16)
    out_bf16 = jax.block_until_ready(out_bf16)
    assert jnp.allclose(out_bf16, ref, atol=5e-2, rtol=5e-2), "bf16 mismatch vs reference"

    print("KERNEL_OK")
</pallas_src>

<mosaic_0001>
module attributes {stable_mosaic.version = 11 : i64} {
  func.func @_qkv_head_kernel(%arg0: i32, %arg1: i32, %arg2: memref<1x8x32xf32, #tpu.memory_space<vmem>>, %arg3: memref<3x4x32x8xf32, #tpu.memory_space<vmem>>, %arg4: memref<3x4x1x8xf32, #tpu.memory_space<vmem>>, %arg5: memref<1x4x8x8xf32, #tpu.memory_space<vmem>>, %arg6: memref<1x4x8x8xf32, #tpu.memory_space<vmem>>, %arg7: memref<1x4x8x8xf32, #tpu.memory_space<vmem>>) attributes {dimension_semantics = [#tpu.dimension_semantics<parallel>, #tpu.dimension_semantics<parallel>], iteration_bounds = array<i64: 2, 1>, scalar_prefetch = 0 : i64, scratch_operands = 0 : i64, tpu.core_type = #tpu.core_type<tc>, window_params = [{transform_indices = @transform_0, window_bounds = array<i64: 1, 8, 32>}, {pipeline_mode = #tpu.pipeline_mode<synchronous>, transform_indices = @transform_1, window_bounds = array<i64: 3, 4, 32, 8>}, {pipeline_mode = #tpu.pipeline_mode<synchronous>, transform_indices = @transform_2, window_bounds = array<i64: 3, 4, 1, 8>}, {transform_indices = @transform_3, window_bounds = array<i64: 1, 4, 8, 8>}, {transform_indices = @transform_4, window_bounds = array<i64: 1, 4, 8, 8>}, {transform_indices = @transform_5, window_bounds = array<i64: 1, 4, 8, 8>}]} {
    %c0 = arith.constant 0 : index
    %c0_0 = arith.constant 0 : index
    %c0_1 = arith.constant 0 : index
    %0 = vector.load %arg2[%c0, %c0_0, %c0_1] : memref<1x8x32xf32, #tpu.memory_space<vmem>>, vector<1x8x32xf32>
    %1 = vector.shape_cast %0 : vector<1x8x32xf32> to vector<8x32xf32>
    %c0_2 = arith.constant 0 : index
    %c0_3 = arith.constant 0 : index
    %c0_4 = arith.constant 0 : index
    %c0_5 = arith.constant 0 : index
    %2 = vector.load %arg3[%c0_2, %c0_3, %c0_4, %c0_5] : memref<3x4x32x8xf32, #tpu.memory_space<vmem>>, vector<1x1x32x8xf32>
    %3 = vector.shape_cast %2 : vector<1x1x32x8xf32> to vector<32x8xf32>
    %cst = arith.constant dense<0.000000e+00> : vector<8x8xf32>
    %4 = tpu.matmul %1, %3, %cst {dimension_numbers = #tpu.dot_dimension_numbers<[1], [0], [0], [1], [0, 0, 1, 1], [], []>} : vector<8x32xf32>, vector<32x8xf32>, vector<8x8xf32> -> vector<8x8xf32>
    %c0_6 = arith.constant 0 : index
    %c0_7 = arith.constant 0 : index
    %c0_8 = arith.constant 0 : index
    %c0_9 = arith.constant 0 : index
    %5 = vector.load %arg4[%c0_6, %c0_7, %c0_8, %c0_9] : memref<3x4x1x8xf32, #tpu.memory_space<vmem>>, vector<1x1x1x8xf32>
    %6 = vector.shape_cast %5 : vector<1x1x1x8xf32> to vector<1x8xf32>
    %7 = vector.broadcast %6 : vector<1x8xf32> to vector<8x8xf32>
    %8 = arith.addf %4, %7 : vector<8x8xf32>
    %c0_10 = arith.constant 0 : index
    %c0_11 = arith.constant 0 : index
    %c0_12 = arith.constant 0 : index
    %c0_13 = arith.constant 0 : index
    %9 = vector.load %arg5[%c0_10, %c0_11, %c0_12, %c0_13] : memref<1x4x8x8xf32, #tpu.memory_space<vmem>>, vector<1x1x8x8xf32>
    %10 = vector.shape_cast %9 : vector<1x1x8x8xf32> to vector<8x8xf32>
    %11 = vector.shape_cast %8 : vector<8x8xf32> to vector<1x1x8x8xf32>
    tpu.vector_store %arg5[%c0_10, %c0_11, %c0_12, %c0_13], %11 {strides = array<i32>} : memref<1x4x8x8xf32, #tpu.memory_space<vmem>>, vector<1x1x8x8xf32>,
    %c0_14 = arith.constant 0 : index
    %c1 = arith.constant 1 : index
    %c0_15 = arith.constant 0 : index
    %c0_16 = arith.constant 0 : index
    %12 = vector.load %arg3[%c0_14, %c1, %c0_15, %c0_16] : memref<3x4x32x8xf32, #tpu.memory_space<vmem>>, vector<1x1x32x8xf32>
    %13 = vector.shape_cast %12 : vector<1x1x32x8xf32> to vector<32x8xf32>
    %cst_17 = arith.constant dense<0.000000e+00> : vector<8x8xf32>
    %14 = tpu.matmul %1, %13, %cst_17 {dimension_numbers = #tpu.dot_dimension_numbers<[1], [0], [0], [1], [0, 0, 1, 1], [], []>} : vector<8x32xf32>, vector<32x8xf32>, vector<8x8xf32> -> vector<8x8xf32>
    %c0_18 = arith.constant 0 : index
    %c1_19 = arith.constant 1 : index
    %c0_20 = arith.constant 0 : index
    %c0_21 = arith.constant 0 : index
    %15 = vector.load %arg4[%c0_18, %c1_19, %c0_20, %c0_21] : memref<3x4x1x8xf32, #tpu.memory_space<vmem>>, vector<1x1x1x8xf32>
    %16 = vector.shape_cast %15 : vector<1x1x1x8xf32> to vector<1x8xf32>
    %17 = vector.broadcast %16 : vector<1x8xf32> to vector<8x8xf32>
    %18 = arith.addf %14, %17 : vector<8x8xf32>
    %c0_22 = arith.constant 0 : index
    %c1_23 = arith.constant 1 : index
    %c0_24 = arith.constant 0 : index
    %c0_25 = arith.constant 0 : index
    %19 = vector.load %arg5[%c0_22, %c1_23, %c0_24, %c0_25] : memref<1x4x8x8xf32, #tpu.memory_space<vmem>>, vector<1x1x8x8xf32>
    %20 = vector.shape_cast %19 : vector<1x1x8x8xf32> to vector<8x8xf32>
    %21 = vector.shape_cast %18 : vector<8x8xf32> to vector<1x1x8x8xf32>
    tpu.vector_store %arg5[%c0_22, %c1_23, %c0_24, %c0_25], %21 {strides = array<i32>} : memref<1x4x8x8xf32, #tpu.memory_space<vmem>>, vector<1x1x8x8xf32>,
    %c0_26 = arith.constant 0 : index
    %c2 = arith.constant 2 : index
    %c0_27 = arith.constant 0 : index
    %c0_28 = arith.constant 0 : index
    %22 = vector.load %arg3[%c0_26, %c2, %c0_27, %c0_28] : memref<3x4x32x8xf32, #tpu.memory_space<vmem>>, vector<1x1x32x8xf32>
    %23 = vector.shape_cast %22 : vector<1x1x32x8xf32> to vector<32x8xf32>
    %cst_29 = arith.constant dense<0.000000e+00> : vector<8x8xf32>
    %24 = tpu.matmul %1, %23, %cst_29 {dimension_numbers = #tpu.dot_dimension_numbers<[1], [0], [0], [1], [0, 0, 1, 1], [], []>} : vector<8x32xf32>, vector<32x8xf32>, vector<8x8xf32> -> vector<8x8xf32>
    %c0_30 = arith.constant 0 : index
    %c2_31 = arith.constant 2 : index
    %c0_32 = arith.constant 0 : index
    %c0_33 = arith.constant 0 : index
    %25 = vector.load %arg4[%c0_30, %c2_31, %c0_32, %c0_33] : memref<3x4x1x8xf32, #tpu.memory_space<vmem>>, vector<1x1x1x8xf32>
    %26 = vector.shape_cast %25 : vector<1x1x1x8xf32> to vector<1x8xf32>
    %27 = vector.broadcast %26 : vector<1x8xf32> to vector<8x8xf32>
    %28 = arith.addf %24, %27 : vector<8x8xf32>
    %c0_34 = arith.constant 0 : index
    %c2_35 = arith.constant 2 : index
    %c0_36 = arith.constant 0 : index
    %c0_37 = arith.constant 0 : index
    %29 = vector.load %arg5[%c0_34, %c2_35, %c0_36, %c0_37] : memref<1x4x8x8xf32, #tpu.memory_space<vmem>>, vector<1x1x8x8xf32>
    %30 = vector.shape_cast %29 : vector<1x1x8x8xf32> to vector<8x8xf32>
    %31 = vector.shape_cast %28 : vector<8x8xf32> to vector<1x1x8x8xf32>
    tpu.vector_store %arg5[%c0_34, %c2_35, %c0_36, %c0_37], %31 {strides = array<i32>} : memref<1x4x8x8xf32, #tpu.memory_space<vmem>>, vector<1x1x8x8xf32>,
    %c0_38 = arith.constant 0 : index
    %c3 = arith.constant 3 : index
    %c0_39 = arith.constant 0 : index
    %c0_40 = arith.constant 0 : index
    %32 = vector.load %arg3[%c0_38, %c3, %c0_39, %c0_40] : memref<3x4x32x8xf32, #tpu.memory_space<vmem>>, vector<1x1x32x8xf32>
    %33 = vector.shape_cast %32 : vector<1x1x32x8xf32> to vector<32x8xf32>
    %cst_41 = arith.constant dense<0.000000e+00> : vector<8x8xf32>
    %34 = tpu.matmul %1, %33, %cst_41 {dimension_numbers = #tpu.dot_dimension_numbers<[1], [0], [0], [1], [0, 0, 1, 1], [], []>} : vector<8x32xf32>, vector<32x8xf32>, vector<8x8xf32> -> vector<8x8xf32>
    %c0_42 = arith.constant 0 : index
    %c3_43 = arith.constant 3 : index
    %c0_44 = arith.constant 0 : index
    %c0_45 = arith.constant 0 : index
    %35 = vector.load %arg4[%c0_42, %c3_43, %c0_44, %c0_45] : memref<3x4x1x8xf32, #tpu.memory_space<vmem>>, vector<1x1x1x8xf32>
    %36 = vector.shape_cast %35 : vector<1x1x1x8xf32> to vector<1x8xf32>
    %37 = vector.broadcast %36 : vector<1x8xf32> to vector<8x8xf32>
    %38 = arith.addf %34, %37 : vector<8x8xf32>
    %c0_46 = arith.constant 0 : index
    %c3_47 = arith.constant 3 : index
    %c0_48 = arith.constant 0 : index
    %c0_49 = arith.constant 0 : index
    %39 = vector.load %arg5[%c0_46, %c3_47, %c0_48, %c0_49] : memref<1x4x8x8xf32, #tpu.memory_space<vmem>>, vector<1x1x8x8xf32>
    %40 = vector.shape_cast %39 : vector<1x1x8x8xf32> to vector<8x8xf32>
    %41 = vector.shape_cast %38 : vector<8x8xf32> to vector<1x1x8x8xf32>
    tpu.vector_store %arg5[%c0_46, %c3_47, %c0_48, %c0_49], %41 {strides = array<i32>} : memref<1x4x8x8xf32, #tpu.memory_space<vmem>>, vector<1x1x8x8xf32>,
    %c1_50 = arith.constant 1 : index
    %c0_51 = arith.constant 0 : index
    %c0_52 = arith.constant 0 : index
    %c0_53 = arith.constant 0 : index
    %42 = vector.load %arg3[%c1_50, %c0_51, %c0_52, %c0_53] : memref<3x4x32x8xf32, #tpu.memory_space<vmem>>, vector<1x1x32x8xf32>
    %43 = vector.shape_cast %42 : vector<1x1x32x8xf32> to vector<32x8xf32>
    %cst_54 = arith.constant dense<0.000000e+00> : vector<8x8xf32>
    %44 = tpu.matmul %1, %43, %cst_54 {dimension_numbers = #tpu.dot_dimension_numbers<[1], [0], [0], [1], [0, 0, 1, 1], [], []>} : vector<8x32xf32>, vector<32x8xf32>, vector<8x8xf32> -> vector<8x8xf32>
    %c1_55 = arith.constant 1 : index
    %c0_56 = arith.constant 0 : index
    %c0_57 = arith.constant 0 : index
    %c0_58 = arith.constant 0 : index
    %45 = vector.load %arg4[%c1_55, %c0_56, %c0_57, %c0_58] : memref<3x4x1x8xf32, #tpu.memory_space<vmem>>, vector<1x1x1x8xf32>
    %46 = vector.shape_cast %45 : vector<1x1x1x8xf32> to vector<1x8xf32>
    %47 = vector.broadcast %46 : vector<1x8xf32> to vector<8x8xf32>
    %48 = arith.addf %44, %47 : vector<8x8xf32>
    %c0_59 = arith.constant 0 : index
    %c0_60 = arith.constant 0 : index
    %c0_61 = arith.constant 0 : index
    %c0_62 = arith.constant 0 : index
    %49 = vector.load %arg6[%c0_59, %c0_60, %c0_61, %c0_62] : memref<1x4x8x8xf32, #tpu.memory_space<vmem>>, vector<1x1x8x8xf32>
    %50 = vector.shape_cast %49 : vector<1x1x8x8xf32> to vector<8x8xf32>
    %51 = vector.shape_cast %48 : vector<8x8xf32> to vector<1x1x8x8xf32>
    tpu.vector_store %arg6[%c0_59, %c0_60, %c0_61, %c0_62], %51 {strides = array<i32>} : memref<1x4x8x8xf32, #tpu.memory_space<vmem>>, vector<1x1x8x8xf32>,
    %c1_63 = arith.constant 1 : index
    %c1_64 = arith.constant 1 : index
    %c0_65 = arith.constant 0 : index
    %c0_66 = arith.constant 0 : index
    %52 = vector.load %arg3[%c1_63, %c1_64, %c0_65, %c0_66] : memref<3x4x32x8xf32, #tpu.memory_space<vmem>>, vector<1x1x32x8xf32>
    %53 = vector.shape_cast %52 : vector<1x1x32x8xf32> to vector<32x8xf32>
    %cst_67 = arith.constant dense<0.000000e+00> : vector<8x8xf32>
    %54 = tpu.matmul %1, %53, %cst_67 {dimension_numbers = #tpu.dot_dimension_numbers<[1], [0], [0], [1], [0, 0, 1, 1], [], []>} : vector<8x32xf32>, vector<32x8xf32>, vector<8x8xf32> -> vector<8x8xf32>
    %c1_68 = arith.constant 1 : index
    %c1_69 = arith.constant 1 : index
    %c0_70 = arith.constant 0 : index
    %c0_71 = arith.constant 0 : index
    %55 = vector.load %arg4[%c1_68, %c1_69, %c0_70, %c0_71] : memref<3x4x1x8xf32, #tpu.memory_space<vmem>>, vector<1x1x1x8xf32>
    %56 = vector.shape_cast %55 : vector<1x1x1x8xf32> to vector<1x8xf32>
    %57 = vector.broadcast %56 : vector<1x8xf32> to vector<8x8xf32>
    %58 = arith.addf %54, %57 : vector<8x8xf32>
    %c0_72 = arith.constant 0 : index
    %c1_73 = arith.constant 1 : index
    %c0_74 = arith.constant 0 : index
    %c0_75 = arith.constant 0 : index
    %59 = vector.load %arg6[%c0_72, %c1_73, %c0_74, %c0_75] : memref<1x4x8x8xf32, #tpu.memory_space<vmem>>, vector<1x1x8x8xf32>
    %60 = vector.shape_cast %59 : vector<1x1x8x8xf32> to vector<8x8xf32>
    %61 = vector.shape_cast %58 : vector<8x8xf32> to vector<1x1x8x8xf32>
    tpu.vector_store %arg6[%c0_72, %c1_73, %c0_74, %c0_75], %61 {strides = array<i32>} : memref<1x4x8x8xf32, #tpu.memory_space<vmem>>, vector<1x1x8x8xf32>,
    %c1_76 = arith.constant 1 : index
    %c2_77 = arith.constant 2 : index
    %c0_78 = arith.constant 0 : index
    %c0_79 = arith.constant 0 : index
    %62 = vector.load %arg3[%c1_76, %c2_77, %c0_78, %c0_79] : memref<3x4x32x8xf32, #tpu.memory_space<vmem>>, vector<1x1x32x8xf32>
    %63 = vector.shape_cast %62 : vector<1x1x32x8xf32> to vector<32x8xf32>
    %cst_80 = arith.constant dense<0.000000e+00> : vector<8x8xf32>
    %64 = tpu.matmul %1, %63, %cst_80 {dimension_numbers = #tpu.dot_dimension_numbers<[1], [0], [0], [1], [0, 0, 1, 1], [], []>} : vector<8x32xf32>, vector<32x8xf32>, vector<8x8xf32> -> vector<8x8xf32>
    %c1_81 = arith.constant 1 : index
    %c2_82 = arith.constant 2 : index
    %c0_83 = arith.constant 0 : index
    %c0_84 = arith.constant 0 : index
    %65 = vector.load %arg4[%c1_81, %c2_82, %c0_83, %c0_84] : memref<3x4x1x8xf32, #tpu.memory_space<vmem>>, vector<1x1x1x8xf32>
    %66 = vector.shape_cast %65 : vector<1x1x1x8xf32> to vector<1x8xf32>
    %67 = vector.broadcast %66 : vector<1x8xf32> to vector<8x8xf32>
    %68 = arith.addf %64, %67 : vector<8x8xf32>
    %c0_85 = arith.constant 0 : index
    %c2_86 = arith.constant 2 : index
    %c0_87 = arith.constant 0 : index
    %c0_88 = arith.constant 0 : index
    %69 = vector.load %arg6[%c0_85, %c2_86, %c0_87, %c0_88] : memref<1x4x8x8xf32, #tpu.memory_space<vmem>>, vector<1x1x8x8xf32>
    %70 = vector.shape_cast %69 : vector<1x1x8x8xf32> to vector<8x8xf32>
    %71 = vector.shape_cast %68 : vector<8x8xf32> to vector<1x1x8x8xf32>
    tpu.vector_store %arg6[%c0_85, %c2_86, %c0_87, %c0_88], %71 {strides = array<i32>} : memref<1x4x8x8xf32, #tpu.memory_space<vmem>>, vector<1x1x8x8xf32>,
    %c1_89 = arith.constant 1 : index
    %c3_90 = arith.constant 3 : index
    %c0_91 = arith.constant 0 : index
    %c0_92 = arith.constant 0 : index
    %72 = vector.load %arg3[%c1_89, %c3_90, %c0_91, %c0_92] : memref<3x4x32x8xf32, #tpu.memory_space<vmem>>, vector<1x1x32x8xf32>
    %73 = vector.shape_cast %72 : vector<1x1x32x8xf32> to vector<32x8xf32>
    %cst_93 = arith.constant dense<0.000000e+00> : vector<8x8xf32>
    %74 = tpu.matmul %1, %73, %cst_93 {dimension_numbers = #tpu.dot_dimension_numbers<[1], [0], [0], [1], [0, 0, 1, 1], [], []>} : vector<8x32xf32>, vector<32x8xf32>, vector<8x8xf32> -> vector<8x8xf32>
    %c1_94 = arith.constant 1 : index
    %c3_95 = arith.constant 3 : index
    %c0_96 = arith.constant 0 : index
    %c0_97 = arith.constant 0 : index
    %75 = vector.load %arg4[%c1_94, %c3_95, %c0_96, %c0_97] : memref<3x4x1x8xf32, #tpu.memory_space<vmem>>, vector<1x1x1x8xf32>
    %76 = vector.shape_cast %75 : vector<1x1x1x8xf32> to vector<1x8xf32>
    %77 = vector.broadcast %76 : vector<1x8xf32> to vector<8x8xf32>
    %78 = arith.addf %74, %77 : vector<8x8xf32>
    %c0_98 = arith.constant 0 : index
    %c3_99 = arith.constant 3 : index
    %c0_100 = arith.constant 0 : index
    %c0_101 = arith.constant 0 : index
    %79 = vector.load %arg6[%c0_98, %c3_99, %c0_100, %c0_101] : memref<1x4x8x8xf32, #tpu.memory_space<vmem>>, vector<1x1x8x8xf32>
    %80 = vector.shape_cast %79 : vector<1x1x8x8xf32> to vector<8x8xf32>
    %81 = vector.shape_cast %78 : vector<8x8xf32> to vector<1x1x8x8xf32>
    tpu.vector_store %arg6[%c0_98, %c3_99, %c0_100, %c0_101], %81 {strides = array<i32>} : memref<1x4x8x8xf32, #tpu.memory_space<vmem>>, vector<1x1x8x8xf32>,
    %c2_102 = arith.constant 2 : index
    %c0_103 = arith.constant 0 : index
    %c0_104 = arith.constant 0 : index
    %c0_105 = arith.constant 0 : index
    %82 = vector.load %arg3[%c2_102, %c0_103, %c0_104, %c0_105] : memref<3x4x32x8xf32, #tpu.memory_space<vmem>>, vector<1x1x32x8xf32>
    %83 = vector.shape_cast %82 : vector<1x1x32x8xf32> to vector<32x8xf32>
    %cst_106 = arith.constant dense<0.000000e+00> : vector<8x8xf32>
    %84 = tpu.matmul %1, %83, %cst_106 {dimension_numbers = #tpu.dot_dimension_numbers<[1], [0], [0], [1], [0, 0, 1, 1], [], []>} : vector<8x32xf32>, vector<32x8xf32>, vector<8x8xf32> -> vector<8x8xf32>
    %c2_107 = arith.constant 2 : index
    %c0_108 = arith.constant 0 : index
    %c0_109 = arith.constant 0 : index
    %c0_110 = arith.constant 0 : index
    %85 = vector.load %arg4[%c2_107, %c0_108, %c0_109, %c0_110] : memref<3x4x1x8xf32, #tpu.memory_space<vmem>>, vector<1x1x1x8xf32>
    %86 = vector.shape_cast %85 : vector<1x1x1x8xf32> to vector<1x8xf32>
    %87 = vector.broadcast %86 : vector<1x8xf32> to vector<8x8xf32>
    %88 = arith.addf %84, %87 : vector<8x8xf32>
    %c0_111 = arith.constant 0 : index
    %c0_112 = arith.constant 0 : index
    %c0_113 = arith.constant 0 : index
    %c0_114 = arith.constant 0 : index
    %89 = vector.load %arg7[%c0_111, %c0_112, %c0_113, %c0_114] : memref<1x4x8x8xf32, #tpu.memory_space<vmem>>, vector<1x1x8x8xf32>
    %90 = vector.shape_cast %89 : vector<1x1x8x8xf32> to vector<8x8xf32>
    %91 = vector.shape_cast %88 : vector<8x8xf32> to vector<1x1x8x8xf32>
    tpu.vector_store %arg7[%c0_111, %c0_112, %c0_113, %c0_114], %91 {strides = array<i32>} : memref<1x4x8x8xf32, #tpu.memory_space<vmem>>, vector<1x1x8x8xf32>,
    %c2_115 = arith.constant 2 : index
    %c1_116 = arith.constant 1 : index
    %c0_117 = arith.constant 0 : index
    %c0_118 = arith.constant 0 : index
    %92 = vector.load %arg3[%c2_115, %c1_116, %c0_117, %c0_118] : memref<3x4x32x8xf32, #tpu.memory_space<vmem>>, vector<1x1x32x8xf32>
    %93 = vector.shape_cast %92 : vector<1x1x32x8xf32> to vector<32x8xf32>
    %cst_119 = arith.constant dense<0.000000e+00> : vector<8x8xf32>
    %94 = tpu.matmul %1, %93, %cst_119 {dimension_numbers = #tpu.dot_dimension_numbers<[1], [0], [0], [1], [0, 0, 1, 1], [], []>} : vector<8x32xf32>, vector<32x8xf32>, vector<8x8xf32> -> vector<8x8xf32>
    %c2_120 = arith.constant 2 : index
    %c1_121 = arith.constant 1 : index
    %c0_122 = arith.constant 0 : index
    %c0_123 = arith.constant 0 : index
    %95 = vector.load %arg4[%c2_120, %c1_121, %c0_122, %c0_123] : memref<3x4x1x8xf32, #tpu.memory_space<vmem>>, vector<1x1x1x8xf32>
    %96 = vector.shape_cast %95 : vector<1x1x1x8xf32> to vector<1x8xf32>
    %97 = vector.broadcast %96 : vector<1x8xf32> to vector<8x8xf32>
    %98 = arith.addf %94, %97 : vector<8x8xf32>
    %c0_124 = arith.constant 0 : index
    %c1_125 = arith.constant 1 : index
    %c0_126 = arith.constant 0 : index
    %c0_127 = arith.constant 0 : index
    %99 = vector.load %arg7[%c0_124, %c1_125, %c0_126, %c0_127] : memref<1x4x8x8xf32, #tpu.memory_space<vmem>>, vector<1x1x8x8xf32>
    %100 = vector.shape_cast %99 : vector<1x1x8x8xf32> to vector<8x8xf32>
    %101 = vector.shape_cast %98 : vector<8x8xf32> to vector<1x1x8x8xf32>
    tpu.vector_store %arg7[%c0_124, %c1_125, %c0_126, %c0_127], %101 {strides = array<i32>} : memref<1x4x8x8xf32, #tpu.memory_space<vmem>>, vector<1x1x8x8xf32>,
    %c2_128 = arith.constant 2 : index
    %c2_129 = arith.constant 2 : index
    %c0_130 = arith.constant 0 : index
    %c0_131 = arith.constant 0 : index
    %102 = vector.load %arg3[%c2_128, %c2_129, %c0_130, %c0_131] : memref<3x4x32x8xf32, #tpu.memory_space<vmem>>, vector<1x1x32x8xf32>
    %103 = vector.shape_cast %102 : vector<1x1x32x8xf32> to vector<32x8xf32>
    %cst_132 = arith.constant dense<0.000000e+00> : vector<8x8xf32>
    %104 = tpu.matmul %1, %103, %cst_132 {dimension_numbers = #tpu.dot_dimension_numbers<[1], [0], [0], [1], [0, 0, 1, 1], [], []>} : vector<8x32xf32>, vector<32x8xf32>, vector<8x8xf32> -> vector<8x8xf32>
    %c2_133 = arith.constant 2 : index
    %c2_134 = arith.constant 2 : index
    %c0_135 = arith.constant 0 : index
    %c0_136 = arith.constant 0 : index
    %105 = vector.load %arg4[%c2_133, %c2_134, %c0_135, %c0_136] : memref<3x4x1x8xf32, #tpu.memory_space<vmem>>, vector<1x1x1x8xf32>
    %106 = vector.shape_cast %105 : vector<1x1x1x8xf32> to vector<1x8xf32>
    %107 = vector.broadcast %106 : vector<1x8xf32> to vector<8x8xf32>
    %108 = arith.addf %104, %107 : vector<8x8xf32>
    %c0_137 = arith.constant 0 : index
    %c2_138 = arith.constant 2 : index
    %c0_139 = arith.constant 0 : index
    %c0_140 = arith.constant 0 : index
    %109 = vector.load %arg7[%c0_137, %c2_138, %c0_139, %c0_140] : memref<1x4x8x8xf32, #tpu.memory_space<vmem>>, vector<1x1x8x8xf32>
    %110 = vector.shape_cast %109 : vector<1x1x8x8xf32> to vector<8x8xf32>
    %111 = vector.shape_cast %108 : vector<8x8xf32> to vector<1x1x8x8xf32>
    tpu.vector_store %arg7[%c0_137, %c2_138, %c0_139, %c0_140], %111 {strides = array<i32>} : memref<1x4x8x8xf32, #tpu.memory_space<vmem>>, vector<1x1x8x8xf32>,
    %c2_141 = arith.constant 2 : index
    %c3_142 = arith.constant 3 : index
    %c0_143 = arith.constant 0 : index
    %c0_144 = arith.constant 0 : index
    %112 = vector.load %arg3[%c2_141, %c3_142, %c0_143, %c0_144] : memref<3x4x32x8xf32, #tpu.memory_space<vmem>>, vector<1x1x32x8xf32>
    %113 = vector.shape_cast %112 : vector<1x1x32x8xf32> to vector<32x8xf32>
    %cst_145 = arith.constant dense<0.000000e+00> : vector<8x8xf32>
    %114 = tpu.matmul %1, %113, %cst_145 {dimension_numbers = #tpu.dot_dimension_numbers<[1], [0], [0], [1], [0, 0, 1, 1], [], []>} : vector<8x32xf32>, vector<32x8xf32>, vector<8x8xf32> -> vector<8x8xf32>
    %c2_146 = arith.constant 2 : index
    %c3_147 = arith.constant 3 : index
    %c0_148 = arith.constant 0 : index
    %c0_149 = arith.constant 0 : index
    %115 = vector.load %arg4[%c2_146, %c3_147, %c0_148, %c0_149] : memref<3x4x1x8xf32, #tpu.memory_space<vmem>>, vector<1x1x1x8xf32>
    %116 = vector.shape_cast %115 : vector<1x1x1x8xf32> to vector<1x8xf32>
    %117 = vector.broadcast %116 : vector<1x8xf32> to vector<8x8xf32>
    %118 = arith.addf %114, %117 : vector<8x8xf32>
    %c0_150 = arith.constant 0 : index
    %c3_151 = arith.constant 3 : index
    %c0_152 = arith.constant 0 : index
    %c0_153 = arith.constant 0 : index
    %119 = vector.load %arg7[%c0_150, %c3_151, %c0_152, %c0_153] : memref<1x4x8x8xf32, #tpu.memory_space<vmem>>, vector<1x1x8x8xf32>
    %120 = vector.shape_cast %119 : vector<1x1x8x8xf32> to vector<8x8xf32>
    %121 = vector.shape_cast %118 : vector<8x8xf32> to vector<1x1x8x8xf32>
    tpu.vector_store %arg7[%c0_150, %c3_151, %c0_152, %c0_153], %121 {strides = array<i32>} : memref<1x4x8x8xf32, #tpu.memory_space<vmem>>, vector<1x1x8x8xf32>,
    return
  }
  func.func @transform_0(%arg0: i32, %arg1: i32) -> (i32, i32, i32) {
    %c0_i32 = arith.constant 0 : i32
    %c0_i32_0 = arith.constant 0 : i32
    return %arg0, %arg1, %c0_i32 : i32, i32, i32
  }
  func.func @transform_1(%arg0: i32, %arg1: i32) -> (i32, i32, i32, i32) {
    %c0_i32 = arith.constant 0 : i32
    %c0_i32_0 = arith.constant 0 : i32
    %c0_i32_1 = arith.constant 0 : i32
    %c0_i32_2 = arith.constant 0 : i32
    %c0_i32_3 = arith.constant 0 : i32
    return %c0_i32, %c0_i32_0, %c0_i32_1, %c0_i32_2 : i32, i32, i32, i32
  }
  func.func @transform_2(%arg0: i32, %arg1: i32) -> (i32, i32, i32, i32) {
    %c0_i32 = arith.constant 0 : i32
    %c0_i32_0 = arith.constant 0 : i32
    %c0_i32_1 = arith.constant 0 : i32
    %c0_i32_2 = arith.constant 0 : i32
    %c0_i32_3 = arith.constant 0 : i32
    return %c0_i32, %c0_i32_0, %c0_i32_1, %c0_i32_2 : i32, i32, i32, i32
  }
  func.func @transform_3(%arg0: i32, %arg1: i32) -> (i32, i32, i32, i32) {
    %c0_i32 = arith.constant 0 : i32
    %c0_i32_0 = arith.constant 0 : i32
    %c0_i32_1 = arith.constant 0 : i32
    return %arg0, %c0_i32, %arg1, %c0_i32_0 : i32, i32, i32, i32
  }
  func.func @transform_4(%arg0: i32, %arg1: i32) -> (i32, i32, i32, i32) {
    %c0_i32 = arith.constant 0 : i32
    %c0_i32_0 = arith.constant 0 : i32
    %c0_i32_1 = arith.constant 0 : i32
    return %arg0, %c0_i32, %arg1, %c0_i32_0 : i32, i32, i32, i32
  }
  func.func @transform_5(%arg0: i32, %arg1: i32) -> (i32, i32, i32, i32) {
    %c0_i32 = arith.constant 0 : i32
    %c0_i32_0 = arith.constant 0 : i32
    %c0_i32_1 = arith.constant 0 : i32
    return %arg0, %c0_i32, %arg1, %c0_i32_0 : i32, i32, i32, i32
  }
}

</mosaic_0001>

<bundles_post_ra>
// kernel: tpu_custom_call.1
= control target key start
LH: loop header
LB: loop body
LE: loop exit
PB: predicated region body
PF: predicated region fallthrough
CT: control target
= control target key end

     0   :  { %11 = vsyncpa [#allocation3], 0  ;;  %s2522_s0 = inlined_call_operand.vmem [shape: f32[2,8,32], index: 0, kind: input, shape index: {}]   ;;  %s2523_s1 = inlined_call_operand.vmem [shape: f32[3,4,32,8], index: 1, kind: input, shape index: {}]   ;;  %s2524_s2 = inlined_call_operand.vmem [shape: f32[3,4,1,8], index: 2, kind: input, shape index: {}]   ;;  %s2525_s3 = inlined_call_operand.hbm [shape: f32[2,4,8,8], index: 3, kind: output, shape index: {0}]   ;;  %s2526_s4 = inlined_call_operand.hbm [shape: f32[2,4,8,8], index: 4, kind: output, shape index: {1}]   ;;  %s2527_s5 = inlined_call_operand.hbm [shape: f32[2,4,8,8], index: 5, kind: output, shape index: {2}]  }
   0x1   :  { %13 = vsyncpa [#allocation3 + $0x1], 0 }
   0x2   :  { %14 = vsyncpa [#allocation5], 0 }
   0x3   :  { %16 = vsyncpa [#allocation5 + $0x1], 0  ;;  %s2030_s18 = smov 0   ;;  %s2032_s19 = smov 0  }
   0x4   :  { %s2034_s20 = smov 0   ;;  %s2036_s21 = smov 0  }
   0x5   :  { %s2038_s22 = smov 0   ;;  %s2040_s23 = smov 0  }
   0x6 LB: > { %s1487_s24 = sadd.s32 4294967295, %s1991_s23   ;;  %s2528_s25 = sadd.s32 4294967294, %s1991_s23   ;;  %s1991_s23 = sphi %s2040_s23, %s22_s23   ;;  %s1987_s22 = sphi %s2038_s22, %s2538_s22   ;;  %s1983_s21 = sphi %s2036_s21, %s2537_s21   ;;  %s1979_s20 = sphi %s2034_s20, %s2536_s20   ;;  %s1975_s19 = sphi %s2032_s19, %s2535_s19   ;;  %s1971_s18 = sphi %s2030_s18, %s2534_s18  }
   0x7   : > { %s34_s26 = sadd.s32 1, %s1987_s22  ;;  %s113_s27 = sadd.s32 1, %s1979_s20 }
   0x8   : > { %p36_p0 = scmp.ge.s32.totalorder %s34_s26, 2  ;;  %p123_p1 = scmp.ne.s32.totalorder %s1979_s20, %s1975_s19 }
   0x9   : > { %p124_p2 = scmp.eq.s32.totalorder %s1487_s24, 1  ;;  %p129_p3 = scmp.ne.s32.totalorder %s1975_s19, %s1971_s18 }
   0xa   : > { %s2540_s26 = smov (%p36_p0, %s34_s26), 0  ;;  %p130_p5 = scmp.eq.s32.totalorder %s2528_s25, 1 }
   0xb   : > { %p2072_p4 = por %p124_p2, %p123_p1  ;;  %s108_s29 = ssub.s32 %s1987_s22, %s2540_s26 }
   0xc   : > { %p1491_p6 = scmp.ge.s32.totalorder %s1991_s23, 1  ;;  %p111_p7 = scmp.eq.s32.totalorder %s108_s29, 0 }
   0xd   : > { %p2081_p8 = por %p130_p5, %p129_p3  ;;  %p220_p9 = scmp.lt.s32.totalorder %s1991_s23, 3 }
   0xe   : > { %s2087_s6 = scalar_select %p111_p7, %s1979_s20, %s113_s27  }
   0xf   : > { %p221_p10 = pnand %p1491_p6, %p220_p9 }
  0x10   : > { %p260_p11 = scmp.lt.s32.totalorder (!%p221_p10), %s1983_s21, 1  ;;  %s243_s17 = sand.u32 (!%p221_p10), 1, %s1975_s19  }
  0x11   : > { %224 = sbr.rel (%p221_p10) target bundleno = 298 (0x12a), region = 32  ;;  %s2337_s27 = sshll.u32 (!%p221_p10), %s243_s17, 5 }
  0x12   : > { %s245_s10 = scalar_lea.vmem (!%p221_p10), [#allocation2], %s2337_s27  ;;  %s2355_s16 = sshll.u32 (!%p221_p10), %s1983_s21, 9 }
  0x13   : > { %s1313_s11 = sshll.u32 (!%p221_p10), %s245_s10, 4  ;;  %s2363_s8 = scalar_lea.hbm (!%p221_p10), %s2525_s3, %s2355_s16  ;;  %s2357_s11 = int_to_ptr.vmem [resolvable:$true] %s1313_s11 }
  0x14   : > { %s1859_s9 = scalar_lea.vmem (!%p221_p10), %s2357_s11, 512 }
  0x15   : > { %p1860_p12 = scmp.ne.s32.totalorder (!%p221_p10), %s2357_s11, %s1859_s9 }
  0x16   : > { %v271_v0 = vld [vmem:[%s2523_s1 + $0x18] sm:$0xff]  ;;  %v1993_v2 = vmov 0.0   ;;  %v270_v3 = vld [vmem:[%s2523_s1 + $0x10] sm:$0xff]  ;;  %s261_s15 = scalar_select %p260_p11, %s1983_s21, 1  ;;  %v269_v5 = vld [vmem:[%s2523_s1 + $0x8] sm:$0xff]  ;;  %vm279_vm0 = vcmask 261120  }
  0x17   : > { %v1501_v1 = vld [vmem:[%s2523_s1 + $0x38] sm:$0xff]  ;;  %1658 = vmatprep.subr.mxu0 %v1993_v2  ;;  %1669 = vmatprep.subr.mxu1 %v1993_v2  ;;  %v1500_v4 = vld [vmem:[%s2523_s1 + $0x30] sm:$0xff]  ;;  %v1499_v6 = vld [vmem:[%s2523_s1 + $0x28] sm:$0xff]  ;;  %vm1994_vm1 = vmmov 0   ;;  %vm353_vm2 = vcmask 64512   ;;  %s2367_s21 = scalar_lea.sflag [#allocation3], %s243_s17  ;;  %p1861_p13 = pnand %p1860_p12, %p2072_p4 }
  0x18   : > { %1659 = vmatpush3.msra.mxu0 %v271_v0  ;;  %1670 = vmatpush3.msra.mxu1 %v1501_v1  ;;  %s1495_s7 = sshll.u32 %s261_s15, 3  ;;  %v268_v7 = vld [vmem:[%s2523_s1] sm:$0xff]  ;;  %v1509_v10 = vld [vmem:[%s2523_s1 + $0x58] sm:$0xff]  ;;  %v1508_v12 = vld [vmem:[%s2523_s1 + $0x50] sm:$0xff] }
  0x19   : > { %1660 = vmatprep.subr.mxu0 %v1993_v2  ;;  %1671 = vmatprep.subr.mxu1 %v1993_v2  ;;  %s266_s12 = scalar_lea.vmem %s2522_s0, %s1495_s7  ;;  %v1498_v8 = vld [vmem:[%s2523_s1 + $0x20] sm:$0xff]  ;;  %v1517_v11 = vld [vmem:[%s2523_s1 + $0x78] sm:$0xff]  ;;  %v1516_v13 = vld [vmem:[%s2523_s1 + $0x70] sm:$0xff]  ;;  %p1862_p0 = pneg %p1861_p13 }
  0x1a   : > { %1661 = vmatpush3.msra.mxu0 %v270_v3  ;;  %1672 = vmatpush3.msra.mxu1 %v1500_v4  ;;  %v2126_v9 = vld [vmem:[%s266_s12] sm:$0xff]  ;;  %v1507_v14 = vld [vmem:[%s2523_s1 + $0x48] sm:$0xff]  ;;  %v1525_v18 = vld [vmem:[%s2523_s1 + $0x98] sm:$0xff]  ;;  %s1995_s12 = smov [#allocation2]  }
  0x1b   : > { %1662 = vmatprep.subr.mxu0 %v1993_v2  ;;  %1673 = vmatprep.subr.mxu1 %v1993_v2  ;;  %v1515_v15 = vld [vmem:[%s2523_s1 + $0x68] sm:$0xff]  ;;  %v1506_v16 = vld [vmem:[%s2523_s1 + $0x40] sm:$0xff]  ;;  %v1532_v19 = vld [vmem:[%s2523_s1 + $0xb8] sm:$0xff]  ;;  %s1863_s13 = sshll.u32 %s1995_s12, 4  ;;  %s1864_s13 = int_to_ptr.vmem [resolvable:$false] %s1863_s13 }
  0x1c   : > { %1663 = vmatpush3.msra.mxu0 %v269_v5  ;;  %1674 = vmatpush3.msra.mxu1 %v1499_v6  ;;  %v1514_v17 = vld [vmem:[%s2523_s1 + $0x60] sm:$0xff]  ;;  %v1524_v20 = vld [vmem:[%s2523_s1 + $0x90] sm:$0xff]  ;;  %v1523_v22 = vld [vmem:[%s2523_s1 + $0x88] sm:$0xff]  ;;  %s1865_s14 = scalar_lea.vmem %s1864_s13, 1024  ;;  %p1866_p1 = scmp.lt.s32.totalorder %s2357_s11, %s1864_s13 }
  0x1d   : > { %1664 = vmatprep.subr.mxu0 %v1993_v2  ;;  %1675 = vmatprep.subr.mxu1 %v1993_v2  ;;  %v1531_v21 = vld [vmem:[%s2523_s1 + $0xb0] sm:$0xff]  ;;  %v1530_v23 = vld [vmem:[%s2523_s1 + $0xa8] sm:$0xff]  ;;  %v1522_v24 = vld [vmem:[%s2523_s1 + $0x80] sm:$0xff]  ;;  %p1867_p2 = scmp.lt.s32.totalorder %s1865_s14, %s1859_s9 }
  0x1e   : > { %1665 = vmatpush3.msra.mxu0 %v268_v7  ;;  %1666 = vmatprep.mubr.msk.f32.mxu0 %vm1994_vm1, %v1993_v2  ;;  %v1529_v25 = vld [vmem:[%s2523_s1 + $0xa0] sm:$0xff]  ;;  %v1540_v26 = vld [vmem:[%s2523_s1 + $0xd8] sm:$0xff]  ;;  %v1539_v28 = vld [vmem:[%s2523_s1 + $0xd0] sm:$0xff] }
  0x1f   : > { %1676 = vmatpush3.msra.mxu1 %v1498_v8  ;;  %1677 = vmatprep.mubr.msk.f32.mxu1 %vm1994_vm1, %v1993_v2  ;;  %v1548_v27 = vld [vmem:[%s2523_s1 + $0xf8] sm:$0xff]  ;;  %v1547_v29 = vld [vmem:[%s2523_s1 + $0xf0] sm:$0xff]  ;;  %v1538_v30 = vld [vmem:[%s2523_s1 + $0xc8] sm:$0xff]  ;;  %p1868_p3 = por %p1867_p2, %p1866_p1 }
  0x20   : > { %1667 = vmatmul.mubr.msk.f32.vlgmr.msra.gmra.mxu0 %vm279_vm0, %v2126_v9  ;;  %1678 = vmatmul.mubr.msk.f32.vlgmr.msra.gmra.mxu1 %vm279_vm0, %v2126_v9  ;;  %v1546_v31 = vld [vmem:[%s2523_s1 + $0xe8] sm:$0xff]  ;;  %v1537_v32 = vld [vmem:[%s2523_s1 + $0xc0] sm:$0xff]  ;;  %v1556_v34 = vld [vmem:[%s2523_s1 + $0x118] sm:$0xff] }
  0x21   : > { %1680 = vmatprep.subr.mxu0 %v1993_v2  ;;  %1691 = vmatprep.subr.mxu1 %v1993_v2  ;;  %v1545_v33 = vld [vmem:[%s2523_s1 + $0xe0] sm:$0xff]  ;;  %v1563_v35 = vld [vmem:[%s2523_s1 + $0x138] sm:$0xff]  ;;  %v1555_v36 = vld [vmem:[%s2523_s1 + $0x110] sm:$0xff]  ;;  %p1869_p5 = pnand %p1868_p3, %p1862_p0 }
  0x22   : > { %1681 = vmatpush3.msra.mxu0 %v1509_v10  ;;  %1692 = vmatpush3.msra.mxu1 %v1517_v11  ;;  %v1562_v37 = vld [vmem:[%s2523_s1 + $0x130] sm:$0xff]  ;;  %v1554_v38 = vld [vmem:[%s2523_s1 + $0x108] sm:$0xff]  ;;  %v1553_v40 = vld [vmem:[%s2523_s1 + $0x100] sm:$0xff] }
  0x23   : > { %1682 = vmatprep.subr.mxu0 %v1993_v2  ;;  %1693 = vmatprep.subr.mxu1 %v1993_v2  ;;  %v1561_v39 = vld [vmem:[%s2523_s1 + $0x128] sm:$0xff]  ;;  %v1560_v41 = vld [vmem:[%s2523_s1 + $0x120] sm:$0xff]  ;;  %v1571_v42 = vld [vmem:[%s2523_s1 + $0x158] sm:$0xff] }
  0x24   : > { %1683 = vmatpush3.msra.mxu0 %v1508_v12  ;;  %1694 = vmatpush3.msra.mxu1 %v1516_v13  ;;  %v1579_v43 = vld [vmem:[%s2523_s1 + $0x178] sm:$0xff]  ;;  %v1570_v44 = vld [vmem:[%s2523_s1 + $0x150] sm:$0xff]  ;;  %v1569_v46 = vld [vmem:[%s2523_s1 + $0x148] sm:$0xff] }
  0x25   : > { %1684 = vmatprep.subr.mxu0 %v1993_v2  ;;  %1695 = vmatprep.subr.mxu1 %v1993_v2  ;;  %v1578_v45 = vld [vmem:[%s2523_s1 + $0x170] sm:$0xff]  ;;  %v1577_v47 = vld [vmem:[%s2523_s1 + $0x168] sm:$0xff]  ;;  %v1568_v48 = vld [vmem:[%s2523_s1 + $0x140] sm:$0xff] }
  0x26   : > { %1685 = vmatpush3.msra.mxu0 %v1507_v14  ;;  %1696 = vmatpush3.msra.mxu1 %v1515_v15  ;;  %v1576_v49 = vld [vmem:[%s2523_s1 + $0x160] sm:$0xff] }
  0x27   : > { %1686 = vmatprep.subr.mxu0 %v1993_v2  ;;  %1697 = vmatprep.subr.mxu1 %v1993_v2  ;;  %v1496_v50 = vld [vmem:[%s2524_s2] ss:$0 sm:$0xff]  ;;  %v1503_v51 = vld [vmem:[%s2524_s2 + $0x1] ss:$0 sm:$0xff]  ;;  %v1511_v58 = vld [vmem:[%s2524_s2 + $0x2] ss:$0 sm:$0xff] }
  0x28   : > { %1687 = vmatpush3.msra.mxu0 %v1506_v16  ;;  %1688 = vmatprep.mubr.msk.f32.mxu0 %vm1994_vm1, %v1993_v2  ;;  %v1519_v59 = vld [vmem:[%s2524_s2 + $0x3] ss:$0 sm:$0xff] }
  0x29   : > { %1698 = vmatpush3.msra.mxu1 %v1514_v17  ;;  %1699 = vmatprep.mubr.msk.f32.mxu1 %vm1994_vm1, %v1993_v2 }
  0x2a   : > { %1689 = vmatmul.mubr.msk.f32.vlgmr.msra.gmra.mxu0 %vm279_vm0, %v2126_v9  ;;  %1700 = vmatmul.mubr.msk.f32.vlgmr.msra.gmra.mxu1 %vm279_vm0, %v2126_v9 }
  0x2b   : > { %1702 = vmatprep.subr.mxu0 %v1993_v2  ;;  %1713 = vmatprep.subr.mxu1 %v1993_v2 }
  0x2c   : > { %1703 = vmatpush3.msra.mxu0 %v1525_v18  ;;  %1714 = vmatpush3.msra.mxu1 %v1532_v19 }
  0x2d   : > { %1704 = vmatprep.subr.mxu0 %v1993_v2  ;;  %1715 = vmatprep.subr.mxu1 %v1993_v2 }
  0x2e   : > { %1705 = vmatpush3.msra.mxu0 %v1524_v20  ;;  %1716 = vmatpush3.msra.mxu1 %v1531_v21 }
  0x2f   : > { %1706 = vmatprep.subr.mxu0 %v1993_v2  ;;  %1717 = vmatprep.subr.mxu1 %v1993_v2 }
  0x30   : > { %1707 = vmatpush3.msra.mxu0 %v1523_v22  ;;  %1718 = vmatpush3.msra.mxu1 %v1530_v23 }
  0x31   : > { %1708 = vmatprep.subr.mxu0 %v1993_v2  ;;  %1719 = vmatprep.subr.mxu1 %v1993_v2 }
  0x32   : > { %1709 = vmatpush3.msra.mxu0 %v1522_v24  ;;  %1710 = vmatprep.mubr.msk.f32.mxu0 %vm1994_vm1, %v1993_v2 }
  0x33   : > { %1720 = vmatpush3.msra.mxu1 %v1529_v25  ;;  %1721 = vmatprep.mubr.msk.f32.mxu1 %vm1994_vm1, %v1993_v2 }
  0x34   : > { %1711 = vmatmul.mubr.msk.f32.vlgmr.msra.gmra.mxu0 %vm279_vm0, %v2126_v9  ;;  %1722 = vmatmul.mubr.msk.f32.vlgmr.msra.gmra.mxu1 %vm279_vm0, %v2126_v9 }
  0x35   : > { %1724 = vmatprep.subr.mxu0 %v1993_v2  ;;  %1735 = vmatprep.subr.mxu1 %v1993_v2 }
  0x36   : > { %1725 = vmatpush3.msra.mxu0 %v1540_v26  ;;  %1736 = vmatpush3.msra.mxu1 %v1548_v27 }
  0x37   : > { %1726 = vmatprep.subr.mxu0 %v1993_v2  ;;  %1737 = vmatprep.subr.mxu1 %v1993_v2 }
  0x38   : > { %1727 = vmatpush3.msra.mxu0 %v1539_v28  ;;  %1738 = vmatpush3.msra.mxu1 %v1547_v29 }
  0x39   : > { %1728 = vmatprep.subr.mxu0 %v1993_v2  ;;  %1739 = vmatprep.subr.mxu1 %v1993_v2 }
  0x3a   : > { %1729 = vmatpush3.msra.mxu0 %v1538_v30  ;;  %1740 = vmatpush3.msra.mxu1 %v1546_v31 }
  0x3b   : > { %1730 = vmatprep.subr.mxu0 %v1993_v2  ;;  %1741 = vmatprep.subr.mxu1 %v1993_v2 }
  0x3c   : > { %1731 = vmatpush3.msra.mxu0 %v1537_v32  ;;  %1732 = vmatprep.mubr.msk.f32.mxu0 %vm1994_vm1, %v1993_v2 }
  0x3d   : > { %1742 = vmatpush3.msra.mxu1 %v1545_v33  ;;  %1743 = vmatprep.mubr.msk.f32.mxu1 %vm1994_vm1, %v1993_v2 }
  0x3e   : > { %1733 = vmatmul.mubr.msk.f32.vlgmr.msra.gmra.mxu0 %vm279_vm0, %v2126_v9  ;;  %1744 = vmatmul.mubr.msk.f32.vlgmr.msra.gmra.mxu1 %vm279_vm0, %v2126_v9 }
  0x3f   : > { %1746 = vmatprep.subr.mxu0 %v1993_v2  ;;  %1757 = vmatprep.subr.mxu1 %v1993_v2 }
  0x40   : > { %1747 = vmatpush3.msra.mxu0 %v1556_v34  ;;  %1758 = vmatpush3.msra.mxu1 %v1563_v35 }
  0x41   : > { %1748 = vmatprep.subr.mxu0 %v1993_v2  ;;  %1759 = vmatprep.subr.mxu1 %v1993_v2 }
  0x42   : > { %1749 = vmatpush3.msra.mxu0 %v1555_v36  ;;  %1760 = vmatpush3.msra.mxu1 %v1562_v37 }
  0x43   : > { %1750 = vmatprep.subr.mxu0 %v1993_v2  ;;  %1761 = vmatprep.subr.mxu1 %v1993_v2 }
  0x44   : > { %1751 = vmatpush3.msra.mxu0 %v1554_v38  ;;  %1762 = vmatpush3.msra.mxu1 %v1561_v39 }
  0x45   : > { %1752 = vmatprep.subr.mxu0 %v1993_v2  ;;  %1763 = vmatprep.subr.mxu1 %v1993_v2 }
  0x46   : > { %1753 = vmatpush3.msra.mxu0 %v1553_v40  ;;  %1754 = vmatprep.mubr.msk.f32.mxu0 %vm1994_vm1, %v1993_v2 }
  0x47   : > { %1764 = vmatpush3.msra.mxu1 %v1560_v41  ;;  %1765 = vmatprep.mubr.msk.f32.mxu1 %vm1994_vm1, %v1993_v2 }
  0x48   : > { %1755 = vmatmul.mubr.msk.f32.vlgmr.msra.gmra.mxu0 %vm279_vm0, %v2126_v9  ;;  %1766 = vmatmul.mubr.msk.f32.vlgmr.msra.gmra.mxu1 %vm279_vm0, %v2126_v9 }
  0x49   : > { %1768 = vmatprep.subr.mxu0 %v1993_v2  ;;  %1779 = vmatprep.subr.mxu1 %v1993_v2 }
  0x4a   : > { %1769 = vmatpush3.msra.mxu0 %v1571_v42  ;;  %1780 = vmatpush3.msra.mxu1 %v1579_v43 }
  0x4b   : > { %1770 = vmatprep.subr.mxu0 %v1993_v2  ;;  %1781 = vmatprep.subr.mxu1 %v1993_v2 }
  0x4c   : > { %1771 = vmatpush3.msra.mxu0 %v1570_v44  ;;  %1782 = vmatpush3.msra.mxu1 %v1578_v45 }
  0x4d   : > { %1772 = vmatprep.subr.mxu0 %v1993_v2  ;;  %1783 = vmatprep.subr.mxu1 %v1993_v2 }
  0x4e   : > { %1773 = vmatpush3.msra.mxu0 %v1569_v46  ;;  %1784 = vmatpush3.msra.mxu1 %v1577_v47 }
  0x4f   : > { %1774 = vmatprep.subr.mxu0 %v1993_v2  ;;  %1785 = vmatprep.subr.mxu1 %v1993_v2 }
  0x50   : > { %1775 = vmatpush3.msra.mxu0 %v1568_v48  ;;  %1776 = vmatprep.mubr.msk.f32.mxu0 %vm1994_vm1, %v1993_v2 }
  0x51   : > { %1786 = vmatpush3.msra.mxu1 %v1576_v49  ;;  %1787 = vmatprep.mubr.msk.f32.mxu1 %vm1994_vm1, %v1993_v2 }
  0x52   : > { %1777 = vmatmul.mubr.msk.f32.vlgmr.msra.gmra.mxu0 %vm279_vm0, %v2126_v9  ;;  %1788 = vmatmul.mubr.msk.f32.vlgmr.msra.gmra.mxu1 %vm279_vm0, %v2126_v9 }
  0xe0   : > { %v349_v52 = vpop.f32.mrf.mxu0  ;;  %v434_v53 = vpop.f32.mrf.mxu1 }
  0xe1   : > { %v350_v54 = vadd.f32 %v1496_v50, %v349_v52  ;;  %v435_v55 = vadd.f32 %v1503_v51, %v434_v53 }
  0xe2   : > { %v1668_v56 = vpop.f32.mrf.mxu0  ;;  %v1679_v57 = vpop.f32.mrf.mxu1 }
  0xe3   : > { %354 = vst.msk [vmem:[%s245_s10] sm:$0xff] %vm353_vm2, %v350_v54  ;;  %1505 = vst.msk [vmem:[%s245_s10 + $0x8] sm:$0xff] %vm353_vm2, %v435_v55 }
  0xea   : > { %v519_v60 = vpop.f32.mrf.mxu0  ;;  %v604_v61 = vpop.f32.mrf.mxu1 }
  0xeb   : > { %v520_v62 = vadd.f32 %v1511_v58, %v519_v60  ;;  %v605_v63 = vadd.f32 %v1519_v59, %v604_v61 }
  0xec   : > { %v1690_v0 = vpop.f32.mrf.mxu0  ;;  %v1701_v1 = vpop.f32.mrf.mxu1 }
  0xed   : > { %1513 = vst.msk [vmem:[%s245_s10 + $0x10] sm:$0xff] %vm353_vm2, %v520_v62  ;;  %1521 = vst.msk [vmem:[%s245_s10 + $0x18] sm:$0xff] %vm353_vm2, %v605_v63 }
  0xee   : > { %1872 = shalt.err (!%p1869_p5)
}
  0xef   : > { %s1873_s17 = scalar_lea.hbm %s2363_s8, 512  ;;  %s1877_s29 = scalar_lea.hbm %s2525_s3, 1024 }
  0xf0   : > { %p1874_p6 = scmp.ne.s32.totalorder %s2363_s8, %s1873_s17  ;;  %p1878_p10 = scmp.lt.s32.totalorder %s2363_s8, %s2525_s3 }
  0xf1   : > { %p1879_p11 = scmp.lt.s32.totalorder %s1877_s29, %s1873_s17 }
  0xf2   : > { %p1875_p7 = pnand %p1874_p6, %p2072_p4 }
  0xf3   : > { %p1880_p12 = por %p1879_p11, %p1878_p10 }
  0xf4   : > { %p1876_p9 = pneg %p1875_p7 }
  0xf6   : > { %p1881_p13 = pnand %p1880_p12, %p1876_p9 }
  0xf8   : > { %1884 = shalt.err (!%p1881_p13)
}
  0xf9   : > { %s1996_s9 = smov 128   ;;  %s1997_s13 = smov 8   ;;  %v1527_v2 = vld [vmem:[%s2524_s2 + $0x4] ss:$0 sm:$0xff]  ;;  %v1534_v3 = vld [vmem:[%s2524_s2 + $0x5] ss:$0 sm:$0xff]  ;;  %v689_v4 = vpop.f32.mrf.mxu0  ;;  %v773_v5 = vpop.f32.mrf.mxu1 }
  0xfa   : > { %1790 = dma.vmem_to_hbm [thread:$0]  (%p2072_p4), %s2357_s11, 512, %s2363_s8, %s2367_s21, %s1996_s9, %s1996_s9, %s1997_s13   ;;  %v690_v6 = vadd.f32 %v1527_v2, %v689_v4  ;;  %v774_v7 = vadd.f32 %v1534_v3, %v773_v5 }
  0xfb   : > { %v1712_v8 = vpop.f32.mrf.mxu0  ;;  %v1723_v9 = vpop.f32.mrf.mxu1  ;;  %s252_s29 = scalar_lea.vmem [#allocation4], %s2337_s27  ;;  %v1542_v10 = vld [vmem:[%s2524_s2 + $0x6] ss:$0 sm:$0xff]  ;;  %v1550_v11 = vld [vmem:[%s2524_s2 + $0x7] ss:$0 sm:$0xff]  ;;  %s2410_s14 = sand.u32 1, %s1487_s24  }
  0xfc   : > { %693 = vst.msk [vmem:[%s252_s29] sm:$0xff] %vm353_vm2, %v690_v6  ;;  %1536 = vst.msk [vmem:[%s252_s29 + $0x8] sm:$0xff] %vm353_vm2, %v774_v7  ;;  %s1330_s11 = sshll.u32 %s252_s29, 4  ;;  %s2418_s15 = scalar_lea.hbm %s2526_s4, %s2355_s16  ;;  %s2412_s11 = int_to_ptr.vmem [resolvable:$true] %s1330_s11 }
  0xfd   : > { %s1885_s8 = scalar_lea.vmem %s2412_s11, 512  ;;  %s1998_s21 = smov [#allocation4]  }
  0xfe   : > { %v858_v12 = vpop.f32.mrf.mxu0  ;;  %v943_v13 = vpop.f32.mrf.mxu1  ;;  %p1886_p0 = scmp.ne.s32.totalorder %s2412_s11, %s1885_s8  ;;  %s1889_s7 = sshll.u32 %s1998_s21, 4  ;;  %s1890_s7 = int_to_ptr.vmem [resolvable:$false] %s1889_s7 }
  0xff   : > { %v859_v14 = vadd.f32 %v1542_v10, %v858_v12  ;;  %v944_v15 = vadd.f32 %v1550_v11, %v943_v13  ;;  %s1891_s12 = scalar_lea.vmem %s1890_s7, 1024  ;;  %p1892_p3 = scmp.lt.s32.totalorder %s2412_s11, %s1890_s7 }
 0x100   : > { %v1734_v16 = vpop.f32.mrf.mxu0  ;;  %v1745_v17 = vpop.f32.mrf.mxu1  ;;  %p1887_p1 = pnand %p1886_p0, %p2072_p4  ;;  %p1893_p5 = scmp.lt.s32.totalorder %s1891_s12, %s1885_s8 }
 0x101   : > { %1544 = vst.msk [vmem:[%s252_s29 + $0x10] sm:$0xff] %vm353_vm2, %v859_v14  ;;  %1552 = vst.msk [vmem:[%s252_s29 + $0x18] sm:$0xff] %vm353_vm2, %v944_v15 }
 0x102   : > { %p1888_p2 = pneg %p1887_p1  ;;  %p1894_p6 = por %p1893_p5, %p1892_p3 }
 0x104   : > { %p1895_p7 = pnand %p1894_p6, %p1888_p2 }
 0x106   : > { %1898 = shalt.err (!%p1895_p7)
}
 0x107   : > { %s1899_s29 = scalar_lea.hbm %s2418_s15, 512  ;;  %s1903_s21 = scalar_lea.hbm %s2526_s4, 1024 }
 0x108   : > { %p1900_p9 = scmp.ne.s32.totalorder %s2418_s15, %s1899_s29  ;;  %p1904_p12 = scmp.lt.s32.totalorder %s2418_s15, %s2526_s4 }
 0x109   : > { %p1905_p13 = scmp.lt.s32.totalorder %s1903_s21, %s1899_s29 }
 0x10a   : > { %p1901_p10 = pnand %p1900_p9, %p2072_p4 }
 0x10b   : > { %p1906_p0 = por %p1905_p13, %p1904_p12 }
 0x10c   : > { %p1902_p11 = pneg %p1901_p10 }
 0x10e   : > { %p1907_p1 = pnand %p1906_p0, %p1902_p11 }
 0x110   : > { %1910 = shalt.err (!%p1907_p1)
}
 0x111   : > { %s2531_s8 = scalar_lea.sflag [#allocation5], %s2410_s14  ;;  %v1558_v18 = vld [vmem:[%s2524_s2 + $0x8] ss:$0 sm:$0xff]  ;;  %v1565_v19 = vld [vmem:[%s2524_s2 + $0x9] ss:$0 sm:$0xff]  ;;  %v1028_v20 = vpop.f32.mrf.mxu0  ;;  %v1112_v21 = vpop.f32.mrf.mxu1  ;;  %s259_s29 = scalar_lea.vmem [#allocation6], %s2337_s27 }
 0x112   : > { %1791 = dma.vmem_to_hbm [thread:$0]  (%p2072_p4), %s2412_s11, 512, %s2418_s15, %s2531_s8, %s1996_s9, %s1996_s9, %s1997_s13   ;;  %v1029_v22 = vadd.f32 %v1558_v18, %v1028_v20  ;;  %v1113_v23 = vadd.f32 %v1565_v19, %v1112_v21 }
 0x113   : > { %v1756_v24 = vpop.f32.mrf.mxu0  ;;  %v1767_v25 = vpop.f32.mrf.mxu1  ;;  %s1347_s11 = sshll.u32 %s259_s29, 4  ;;  %v1573_v26 = vld [vmem:[%s2524_s2 + $0xa] ss:$0 sm:$0xff]  ;;  %v1581_v27 = vld [vmem:[%s2524_s2 + $0xb] ss:$0 sm:$0xff]  ;;  %s2469_s7 = scalar_lea.hbm %s2527_s5, %s2355_s16  ;;  %s2463_s11 = int_to_ptr.vmem [resolvable:$true] %s1347_s11 }
 0x114   : > { %1032 = vst.msk [vmem:[%s259_s29] sm:$0xff] %vm353_vm2, %v1029_v22  ;;  %1567 = vst.msk [vmem:[%s259_s29 + $0x8] sm:$0xff] %vm353_vm2, %v1113_v23  ;;  %s1911_s12 = scalar_lea.vmem %s2463_s11, 512  ;;  %s1999_s25 = smov [#allocation6]  }
 0x115   : > { %v1197_v28 = vpop.f32.mrf.mxu0  ;;  %v1282_v29 = vpop.f32.mrf.mxu1  ;;  %p1912_p2 = scmp.ne.s32.totalorder %s2463_s11, %s1911_s12  ;;  %s1915_s24 = sshll.u32 %s1999_s25, 4  ;;  %s1916_s24 = int_to_ptr.vmem [resolvable:$false] %s1915_s24 }
 0x116   : > { %v1198_v30 = vadd.f32 %v1573_v26, %v1197_v28  ;;  %v1283_v31 = vadd.f32 %v1581_v27, %v1282_v29  ;;  %s1917_s15 = scalar_lea.vmem %s1916_s24, 1024  ;;  %p1918_p6 = scmp.lt.s32.totalorder %s2463_s11, %s1916_s24 }
 0x117   : > { %v1778_v32 = vpop.f32.mrf.mxu0  ;;  %v1789_v33 = vpop.f32.mrf.mxu1  ;;  %p1913_p3 = pnand %p1912_p2, %p2072_p4  ;;  %p1919_p7 = scmp.lt.s32.totalorder %s1917_s15, %s1911_s12 }
 0x118   : > { %1575 = vst.msk [vmem:[%s259_s29 + $0x10] sm:$0xff] %vm353_vm2, %v1198_v30  ;;  %1583 = vst.msk [vmem:[%s259_s29 + $0x18] sm:$0xff] %vm353_vm2, %v1283_v31 }
 0x119   : > { %p1914_p5 = pneg %p1913_p3  ;;  %p1920_p9 = por %p1919_p7, %p1918_p6 }
 0x11b   : > { %p1921_p10 = pnand %p1920_p9, %p1914_p5 }
 0x11d   : > { %1924 = shalt.err (!%p1921_p10)
}
 0x11e   : > { %s1925_s16 = scalar_lea.hbm %s2469_s7, 512  ;;  %s1929_s17 = scalar_lea.hbm %s2527_s5, 1024 }
 0x11f   : > { %p1926_p11 = scmp.ne.s32.totalorder %s2469_s7, %s1925_s16  ;;  %p1930_p0 = scmp.lt.s32.totalorder %s2469_s7, %s2527_s5 }
 0x120   : > { %p1931_p1 = scmp.lt.s32.totalorder %s1929_s17, %s1925_s16 }
 0x121   : > { %p1927_p12 = pnand %p1926_p11, %p2072_p4 }
 0x122   : > { %p1932_p2 = por %p1931_p1, %p1930_p0 }
 0x123   : > { %p1928_p13 = pneg %p1927_p12 }
 0x125   : > { %p1933_p3 = pnand %p1932_p2, %p1928_p13 }
 0x127   : > { %1936 = shalt.err (!%p1933_p3)
}
 0x128   : > { %s2532_s8 = scalar_lea.sflag [#allocation5], %s2410_s14 }
 0x129   : > { %1792 = dma.vmem_to_hbm [thread:$0]  (%p2072_p4), %s2463_s11, 512, %s2469_s7, %s2532_s8, %s1996_s9, %s1996_s9, %s1997_s13  }
 0x12a PF: > { %p1806_p5 = scmp.ge.s32.totalorder %s1991_s23, 2  ;;  %s1362_s12 = sand.u32 1, %s1971_s18  }
 0x12b   : > { %s1363_s25 = scalar_lea.sflag [#allocation3], %s1362_s12 }
 0x12c   : > { %p1797_p6 = pnand %p1806_p5, %p2081_p8 }
 0x12e   : > { %p1798_p7 = pneg %p1797_p6 }
 0x130   : > { %1962 = dma.done.wait (%p1798_p7), %s1363_s25, 512  }
 0x131   : > { %1964 = vsyncadd (%p1798_p7), %s1363_s25, 4294966784  ;;  %s2533_s28 = sadd.s32 4294967294, %s1991_s23  }
 0x132   : > { %s1371_s24 = sand.u32 1, %s2533_s28  }
 0x133   : > { %s1372_s15 = scalar_lea.sflag [#allocation5], %s1371_s24 }
 0x134   : > { %1966 = dma.done.wait (%p1798_p7), %s1372_s15, 1024  }
 0x135   : > { %1968 = vsyncadd (%p1798_p7), %s1372_s15, 4294966272  ;;  %s22_s23 = sadd.s32 1, %s1991_s23   ;;  %s2534_s18 = smov %s1975_s19 }
 0x136   : > { %p19_p4 = scmp.ge.s32.totalorder %s22_s23, 4   ;;  %s2535_s19 = smov %s1979_s20 }
 0x137   : > { %s2536_s20 = smov %s2087_s6  ;;  %s2537_s21 = smov %s1987_s22 }
 0x138   : > { %s2538_s22 = smov %s2540_s26  ;;  %21 = sbr.rel (!%p19_p4) target bundleno = 6 (0x6), region = 130 }
 0x13d   :  { %1386 = vsyncpa [#allocation3], 1 }
 0x13e   :  { %1388 = vsyncpa [#allocation3 + $0x1], 1 }
 0x13f   :  { %1389 = vsyncpa [#allocation5], 1 }
 0x140   :  { %1391 = vsyncpa [#allocation5 + $0x1], 1 }

</bundles_post_ra>
